<compile_context>
chip_gen: v7x
topology: tpu7x:2x2x1
jax: 0.10.0
libtpu: 0.0.40
codegen_flags: <defaults>
</compile_context>

<pallas_src>
import numpy as np
import jax
import jax.numpy as jnp
from jax.experimental import pallas as pl
from jax.experimental.pallas import tpu as pltpu

LABEL_NUM = 8                 # config.LabelNum (synthetic choice)
N_PAD = 128                   # lane-dense classifier / output width
L_IN = 128                    # conv1 input length
L1 = (L_IN - 4) // 2 + 1      # 63  (Conv1d k=4, s=2)
L2 = (L1 - 3) // 3 + 1        # 21  (Conv1d k=3, s=3)
L1_PAD = 64                   # lane-friendly padded widths
L2_PAD = 32
SUB_F = 12                    # subpayload feature dim so that 21 + 12 = 33
FEAT = 16 * (L2 + SUB_F)      # 16 * 33 = 528
NEG_SLOPE = 0.01              # LeakyReLU default
BN_EPS = 1e-5
NEG_BIG = -1e30               # softmax pad value


def _conv_matrix_padded(w, l_in, k, stride, rows_pad, cols_pad):
    """Dense (rows_pad, cols_pad) matrix implementing 1-channel Conv1d correlation.

    Rows >= l_in and cols >= l_out are left zero so padding is inert.
    """
    l_out = (l_in - k) // stride + 1
    m = np.zeros((rows_pad, cols_pad), dtype=np.float32)
    for o in range(l_out):
        for kk in range(k):
            m[o * stride + kk, o] = w[kk]
    return m


# ----------------------------- Fused Pallas kernel ---------------------------

def payload_encoder_kernel(x_ref, sub_ref, w1_ref, w2_ref, wcp_ref, wcs_ref,
                           cb_ref, bclf_ref, out_ref, y2_scr, fus_scr):
    # x_ref:   (tb*16, 128) bf16   payload rows of the current batch tile
    # sub_ref: (tb, 192)    bf16   flattened subpayload
    # w1_ref:  (128, 64)    bf16   conv1 Toeplitz (BN folded, padded)
    # w2_ref:  (64, 32)     bf16   conv2 Toeplitz (BN folded, padded; row 63 = 0)
    # wcp_ref: (512, 128)   f32    classifier weight, payload part (dup cols 0:8/8:16)
    # wcs_ref: (192, 128)   bf16   classifier weight, subpayload part
    # cb_ref (SMEM): (2,)   f32    folded conv biases
    # bclf_ref:(1, 128)     f32    classifier bias (-1e30 on pad lanes >= 16)
    # out_ref: (tb, 128)    f32    lanes 0:8 = logits, lanes 8:16 = softmax probs
    # y2_scr:  (tb*16, 32)  f32    conv2 output
    # fus_scr: (tb, 512)    f32    conv2 output regrouped to (batch, pos*32) lanes
    tb = out_ref.shape[0]

    # Conv stack as two dense Toeplitz matmuls over the whole payload tile.
    y1 = jnp.dot(x_ref[...], w1_ref[...],
                 preferred_element_type=jnp.float32) + cb_ref[0]
    y1 = jnp.maximum(y1, NEG_SLOPE * y1)                                 # LeakyReLU
    y2 = jnp.dot(y1.astype(jnp.bfloat16), w2_ref[...],
                 preferred_element_type=jnp.float32) + cb_ref[1]
    y2 = jnp.maximum(y2, NEG_SLOPE * y2)                                 # (tb*16, 32)
    y2_scr[...] = y2

    # Regroup rows (b*16 + h, :) -> lanes (b, h*32 : h*32+32) so the payload part of
    # the classifier is a single (tb, 512) @ (512, 128) matmul instead of 16
    # accumulator round trips.
    for h in range(16):                                                  # static unroll
        fus_scr[:, h * L2_PAD:(h + 1) * L2_PAD] = y2_scr[pl.ds(h, tb, stride=16), :]

    logits = (jnp.dot(fus_scr[...], wcp_ref[...], preferred_element_type=jnp.float32)
              + jnp.dot(sub_ref[...], wcs_ref[...], preferred_element_type=jnp.float32)
              + bclf_ref[...])                                           # (tb, 128)

    # Softmax over the duplicated block (lanes 8:16); lanes >=16 carry bias -1e30 and
    # lanes 0:8 (the logits copy) are masked out so they do not pollute the sum.
    lane = jax.lax.broadcasted_iota(jnp.int32, logits.shape, 1)
    lm = jnp.where(lane >= LABEL_NUM, logits, NEG_BIG)
    m = jnp.max(lm, axis=-1, keepdims=True)
    e = jnp.exp(lm - m)
    inv = pl.reciprocal(jnp.sum(e, axis=-1, keepdims=True), approx=True)  # EUP slot
    probs = e * inv

    # Single lane-dense slab: logits in lanes 0:8, probs in lanes 8:16, zeros after.
    out_ref[...] = jnp.where(lane < LABEL_NUM, logits, probs)


# ------------------------------ Wrapper --------------------------------------

def payload_encoder_forward(payload, subpayload, params, max_tile_b=512):
    B = payload.shape[0]
    # Batch tile: multiple of 8 (sublane-aligned BlockSpecs); default 512 so each grid
    # step moves ~2 MiB of bf16 payload (per-step overhead < 20% of DMA time).
    tb = min(max_tile_b, ((B + 7) // 8) * 8)
    Bp = ((B + tb - 1) // tb) * tb
    if Bp != B:
        pad = Bp - B
        payload = jnp.pad(payload, ((0, pad), (0, 0), (0, 0)))
        subpayload = jnp.pad(subpayload, ((0, pad), (0, 0), (0, 0)))

    # bf16 ingress (ideally the producer already emits bf16; this cast is a no-op then).
    pld2d = payload.reshape(Bp * 16, L_IN).astype(jnp.bfloat16)     # (Bp*16, 128)
    sub2d = subpayload.reshape(Bp, 16 * SUB_F).astype(jnp.bfloat16)  # (Bp, 192)
    grid = (Bp // tb,)

    flops = 2 * Bp * 16 * (L_IN * L1_PAD + L1_PAD * L2_PAD) \
        + 2 * Bp * (16 * L2_PAD + 16 * SUB_F) * N_PAD
    bytes_accessed = (Bp * 16 * L_IN * 2 + Bp * 16 * SUB_F * 2 + Bp * N_PAD * 4
                      + (L_IN * L1_PAD + L1_PAD * L2_PAD + 16 * SUB_F * N_PAD) * 2
                      + 16 * L2_PAD * N_PAD * 4 + N_PAD * 4 + 2 * 4)
    cost = pl.CostEstimate(flops=flops, transcendentals=Bp * N_PAD,
                           bytes_accessed=bytes_accessed)

    out = pl.pallas_call(
        payload_encoder_kernel,
        out_shape=jax.ShapeDtypeStruct((Bp, N_PAD), jnp.float32),
        grid=grid,
        in_specs=[
            pl.BlockSpec((tb * 16, L_IN), lambda i: (i, 0)),
            pl.BlockSpec((tb, 16 * SUB_F), lambda i: (i, 0)),
            pl.BlockSpec((L_IN, L1_PAD), lambda i: (0, 0)),
            pl.BlockSpec((L1_PAD, L2_PAD), lambda i: (0, 0)),
            pl.BlockSpec((16 * L2_PAD, N_PAD), lambda i: (0, 0)),
            pl.BlockSpec((16 * SUB_F, N_PAD), lambda i: (0, 0)),
            pl.BlockSpec(memory_space=pltpu.MemorySpace.SMEM),
            pl.BlockSpec((1, N_PAD), lambda i: (0, 0)),
        ],
        out_specs=pl.BlockSpec((tb, N_PAD), lambda i: (i, 0)),
        scratch_shapes=[pltpu.VMEM((tb * 16, L2_PAD), jnp.float32),
                        pltpu.VMEM((tb, 16 * L2_PAD), jnp.float32)],
        compiler_params=pltpu.CompilerParams(
            dimension_semantics=("parallel",),      # on v7x consider CORE_PARALLEL if one TC idles
            vmem_limit_bytes=32 * 1024 * 1024),
        cost_estimate=cost,
    )(pld2d, sub2d, params["w1_eff"], params["w2_eff"],
      params["wc_pld"], params["wc_sub"], params["cbias"], params["bclf"])

    logits = out[:B, :LABEL_NUM]
    probs = out[:B, LABEL_NUM:2 * LABEL_NUM]
    return logits, probs                              # (activeVector, softmax)


# -------------------------- Parameter construction ---------------------------

def init_params(key):
    k1, k2, k3, k4, k5, k6 = jax.random.split(key, 6)
    # Conv weights: torch.nn.init.normal_(mean=0, std=0.02); biases: small deterministic.
    conv1_w = 0.02 * jax.random.normal(k1, (4,), jnp.float32)
    conv1_b = 0.1 * jax.random.normal(k2, (), jnp.float32)
    conv2_w = 0.02 * jax.random.normal(k3, (3,), jnp.float32)
    conv2_b = 0.1 * jax.random.normal(k4, (), jnp.float32)
    # Linear(528 -> LabelNum)
    wclf = jax.random.normal(k5, (LABEL_NUM, FEAT), jnp.float32) / np.sqrt(FEAT)
    bclf = jax.random.normal(k6, (LABEL_NUM,), jnp.float32) / np.sqrt(FEAT)
    raw = dict(conv1_w=conv1_w, conv1_b=conv1_b, conv2_w=conv2_w, conv2_b=conv2_b,
               wclf=wclf, bclf=bclf)

    # BatchNorm1d(1) eval mode with default buffers -> pure scale 1/sqrt(1+eps).
    bn = np.float32(1.0 / np.sqrt(1.0 + BN_EPS))
    w1_eff = jnp.asarray(
        _conv_matrix_padded(np.asarray(conv1_w), L_IN, 4, 2, L_IN, L1_PAD) * bn,
        jnp.bfloat16)
    w2_eff = jnp.asarray(
        _conv_matrix_padded(np.asarray(conv2_w), L1, 3, 3, L1_PAD, L2_PAD) * bn,
        jnp.bfloat16)
    cbias = jnp.stack([conv1_b * bn, conv2_b * bn]).astype(jnp.float32)

    # Classifier weight, lane-dense (N=128): the real 8 output columns are duplicated
    # into lanes 0:8 (logits) and 8:16 (softmax source); everything else is zero.
    wt = np.asarray(wclf).T                                   # (528, 8)
    wt128 = np.zeros((FEAT, N_PAD), np.float32)
    wt128[:, :LABEL_NUM] = wt
    wt128[:, LABEL_NUM:2 * LABEL_NUM] = wt
    wt3 = wt128.reshape(16, L2 + SUB_F, N_PAD)                # (16, 33, 128)
    wc_pld_np = np.zeros((16, L2_PAD, N_PAD), np.float32)     # pad conv features 21->32
    wc_pld_np[:, :L2, :] = wt3[:, :L2, :]
    wc_pld = jnp.asarray(wc_pld_np.reshape(16 * L2_PAD, N_PAD), jnp.float32)
    wc_sub = jnp.asarray(wt3[:, L2:, :].reshape(16 * SUB_F, N_PAD), jnp.bfloat16)

    # Bias: real bias duplicated into lanes 0:8 / 8:16, -1e30 on pad lanes so the
    # softmax denominator ignores them.
    bclf_np = np.full((1, N_PAD), NEG_BIG, np.float32)
    bclf_np[0, :LABEL_NUM] = np.asarray(bclf)
    bclf_np[0, LABEL_NUM:2 * LABEL_NUM] = np.asarray(bclf)

    params = dict(w1_eff=w1_eff, w2_eff=w2_eff, cbias=cbias,
                  wc_pld=wc_pld, wc_sub=wc_sub, bclf=jnp.asarray(bclf_np))
    return params, raw


# ------------------------ Independent pure-JAX reference ---------------------

def reference(payload, subpayload, raw):
    """Reference built directly from the raw Conv1d/BatchNorm/Linear parameters
    (no folded Toeplitz matrices), so it checks the lowering independently."""
    B = payload.shape[0]
    bn = 1.0 / np.sqrt(1.0 + BN_EPS)
    x = payload.reshape(-1, L_IN)
    y1 = jnp.stack([jnp.sum(x[:, 2 * o:2 * o + 4] * raw["conv1_w"], axis=-1)
                    for o in range(L1)], axis=-1)
    y1 = (y1 + raw["conv1_b"]) * bn
    y1 = jnp.where(y1 >= 0, y1, NEG_SLOPE * y1)
    y2 = jnp.stack([jnp.sum(y1[:, 3 * o:3 * o + 3] * raw["conv2_w"], axis=-1)
                    for o in range(L2)], axis=-1)
    y2 = (y2 + raw["conv2_b"]) * bn
    y2 = jnp.where(y2 >= 0, y2, NEG_SLOPE * y2)
    fusion = jnp.concatenate([y2.reshape(B, 16, L2), subpayload], axis=2).reshape(B, -1)
    logits = fusion @ raw["wclf"].T + raw["bclf"]
    return logits, jax.nn.softmax(logits, axis=1)


# ---------------------------------- Main --------------------------------------

if __name__ == "__main__":
    key = jax.random.PRNGKey(0)
    kp, ks, kw = jax.random.split(key, 3)
    B = 2
    payload = jax.random.normal(kp, (B, 16, L_IN), jnp.float32)      # (2, 16, 128)
    subpayload = jax.random.normal(ks, (B, 16, SUB_F), jnp.float32)  # (2, 16, 12)
    params, raw = init_params(kw)

    fwd = jax.jit(payload_encoder_forward)
    logits, probs = fwd(payload, subpayload, params)
    jax.block_until_ready((logits, probs))

    ref_logits, ref_probs = reference(payload, subpayload, raw)
    # Tolerance covers bf16 ingress/weights with f32 accumulation vs the exact f32 VPU
    # reference, plus the approximate EUP reciprocal in the softmax (probs sum to 1
    # only to ~1e-3 relative).
    np.testing.assert_allclose(np.asarray(logits), np.asarray(ref_logits),
                               rtol=2e-2, atol=2e-2)
    np.testing.assert_allclose(np.asarray(probs), np.asarray(ref_probs),
                               rtol=2e-2, atol=2e-2)
    assert logits.shape == (B, LABEL_NUM) and probs.shape == (B, LABEL_NUM)

    print("KERNEL_OK")
</pallas_src>

<mosaic_0001>
module attributes {stable_mosaic.version = 11 : i64} {
  func.func @payload_encoder_kernel(%arg0: i32, %arg1: memref<128x128xbf16, #tpu.memory_space<vmem>>, %arg2: memref<8x192xbf16, #tpu.memory_space<vmem>>, %arg3: memref<128x64xbf16, #tpu.memory_space<vmem>>, %arg4: memref<64x32xbf16, #tpu.memory_space<vmem>>, %arg5: memref<512x128xf32, #tpu.memory_space<vmem>>, %arg6: memref<192x128xbf16, #tpu.memory_space<vmem>>, %arg7: memref<2xf32, #tpu.memory_space<smem>>, %arg8: memref<1x128xf32, #tpu.memory_space<vmem>>, %arg9: memref<8x128xf32, #tpu.memory_space<vmem>>, %arg10: memref<128x32xf32, #tpu.memory_space<vmem>>, %arg11: memref<8x512xf32, #tpu.memory_space<vmem>>) attributes {dimension_semantics = [#tpu.dimension_semantics<parallel>], iteration_bounds = array<i64: 1>, scalar_prefetch = 0 : i64, scratch_operands = 2 : i64, tpu.core_type = #tpu.core_type<tc>, window_params = [{transform_indices = @transform_0, window_bounds = array<i64: 128, 128>}, {transform_indices = @transform_1, window_bounds = array<i64: 8, 192>}, {pipeline_mode = #tpu.pipeline_mode<synchronous>, transform_indices = @transform_2, window_bounds = array<i64: 128, 64>}, {pipeline_mode = #tpu.pipeline_mode<synchronous>, transform_indices = @transform_3, window_bounds = array<i64: 64, 32>}, {pipeline_mode = #tpu.pipeline_mode<synchronous>, transform_indices = @transform_4, window_bounds = array<i64: 512, 128>}, {pipeline_mode = #tpu.pipeline_mode<synchronous>, transform_indices = @transform_5, window_bounds = array<i64: 192, 128>}, {transform_indices = @transform_6, window_bounds = array<i64: 2>}, {pipeline_mode = #tpu.pipeline_mode<synchronous>, transform_indices = @transform_7, window_bounds = array<i64: 1, 128>}, {transform_indices = @transform_8, window_bounds = array<i64: 8, 128>}]} {
    %c0 = arith.constant 0 : index
    %c0_0 = arith.constant 0 : index
    %0 = vector.load %arg1[%c0, %c0_0] : memref<128x128xbf16, #tpu.memory_space<vmem>>, vector<128x128xbf16>
    %c0_1 = arith.constant 0 : index
    %c0_2 = arith.constant 0 : index
    %1 = vector.load %arg3[%c0_1, %c0_2] : memref<128x64xbf16, #tpu.memory_space<vmem>>, vector<128x64xbf16>
    %cst = arith.constant dense<0.000000e+00> : vector<128x64xf32>
    %2 = tpu.matmul %0, %1, %cst {dimension_numbers = #tpu.dot_dimension_numbers<[1], [0], [0], [1], [0, 0, 1, 1], [], []>} : vector<128x128xbf16>, vector<128x64xbf16>, vector<128x64xf32> -> vector<128x64xf32>
    %c0_3 = arith.constant 0 : index
    %3 = memref.load %arg7[%c0_3] : memref<2xf32, #tpu.memory_space<smem>>
    %4 = vector.broadcast %3 : f32 to vector<128x64xf32>
    %5 = arith.addf %2, %4 : vector<128x64xf32>
    %cst_4 = arith.constant 0.00999999977 : f32
    %6 = vector.broadcast %cst_4 : f32 to vector<128x64xf32>
    %7 = arith.mulf %6, %5 : vector<128x64xf32>
    %8 = arith.maximumf %5, %7 : vector<128x64xf32>
    %9 = arith.truncf %8 : vector<128x64xf32> to vector<128x64xbf16>
    %c0_5 = arith.constant 0 : index
    %c0_6 = arith.constant 0 : index
    %10 = vector.load %arg4[%c0_5, %c0_6] : memref<64x32xbf16, #tpu.memory_space<vmem>>, vector<64x32xbf16>
    %cst_7 = arith.constant dense<0.000000e+00> : vector<128x32xf32>
    %11 = tpu.matmul %9, %10, %cst_7 {dimension_numbers = #tpu.dot_dimension_numbers<[1], [0], [0], [1], [0, 0, 1, 1], [], []>} : vector<128x64xbf16>, vector<64x32xbf16>, vector<128x32xf32> -> vector<128x32xf32>
    %c1 = arith.constant 1 : index
    %12 = memref.load %arg7[%c1] : memref<2xf32, #tpu.memory_space<smem>>
    %13 = vector.broadcast %12 : f32 to vector<128x32xf32>
    %14 = arith.addf %11, %13 : vector<128x32xf32>
    %cst_8 = arith.constant 0.00999999977 : f32
    %15 = vector.broadcast %cst_8 : f32 to vector<128x32xf32>
    %16 = arith.mulf %15, %14 : vector<128x32xf32>
    %17 = arith.maximumf %14, %16 : vector<128x32xf32>
    %c0_9 = arith.constant 0 : index
    %c0_10 = arith.constant 0 : index
    %18 = vector.load %arg10[%c0_9, %c0_10] : memref<128x32xf32, #tpu.memory_space<vmem>>, vector<128x32xf32>
    tpu.vector_store %arg10[%c0_9, %c0_10], %17 {strides = array<i32>} : memref<128x32xf32, #tpu.memory_space<vmem>>, vector<128x32xf32>,
    %c0_11 = arith.constant 0 : index
    %c0_12 = arith.constant 0 : index
    %19 = tpu.strided_load %arg10[%c0_11, %c0_12] {strides = array<i32: 16, 1>} : memref<128x32xf32, #tpu.memory_space<vmem>>, vector<8x32xf32>
    %c0_13 = arith.constant 0 : index
    %c0_14 = arith.constant 0 : index
    %20 = vector.load %arg11[%c0_13, %c0_14] : memref<8x512xf32, #tpu.memory_space<vmem>>, vector<8x32xf32>
    tpu.vector_store %arg11[%c0_13, %c0_14], %19 {strides = array<i32>} : memref<8x512xf32, #tpu.memory_space<vmem>>, vector<8x32xf32>,
    %c1_15 = arith.constant 1 : index
    %c0_16 = arith.constant 0 : index
    %21 = tpu.strided_load %arg10[%c1_15, %c0_16] {strides = array<i32: 16, 1>} : memref<128x32xf32, #tpu.memory_space<vmem>>, vector<8x32xf32>
    %c0_17 = arith.constant 0 : index
    %c32 = arith.constant 32 : index
    %22 = vector.load %arg11[%c0_17, %c32] : memref<8x512xf32, #tpu.memory_space<vmem>>, vector<8x32xf32>
    tpu.vector_store %arg11[%c0_17, %c32], %21 {strides = array<i32>} : memref<8x512xf32, #tpu.memory_space<vmem>>, vector<8x32xf32>,
    %c2 = arith.constant 2 : index
    %c0_18 = arith.constant 0 : index
    %23 = tpu.strided_load %arg10[%c2, %c0_18] {strides = array<i32: 16, 1>} : memref<128x32xf32, #tpu.memory_space<vmem>>, vector<8x32xf32>
    %c0_19 = arith.constant 0 : index
    %c64 = arith.constant 64 : index
    %24 = vector.load %arg11[%c0_19, %c64] : memref<8x512xf32, #tpu.memory_space<vmem>>, vector<8x32xf32>
    tpu.vector_store %arg11[%c0_19, %c64], %23 {strides = array<i32>} : memref<8x512xf32, #tpu.memory_space<vmem>>, vector<8x32xf32>,
    %c3 = arith.constant 3 : index
    %c0_20 = arith.constant 0 : index
    %25 = tpu.strided_load %arg10[%c3, %c0_20] {strides = array<i32: 16, 1>} : memref<128x32xf32, #tpu.memory_space<vmem>>, vector<8x32xf32>
    %c0_21 = arith.constant 0 : index
    %c96 = arith.constant 96 : index
    %26 = vector.load %arg11[%c0_21, %c96] : memref<8x512xf32, #tpu.memory_space<vmem>>, vector<8x32xf32>
    tpu.vector_store %arg11[%c0_21, %c96], %25 {strides = array<i32>} : memref<8x512xf32, #tpu.memory_space<vmem>>, vector<8x32xf32>,
    %c4 = arith.constant 4 : index
    %c0_22 = arith.constant 0 : index
    %27 = tpu.strided_load %arg10[%c4, %c0_22] {strides = array<i32: 16, 1>} : memref<128x32xf32, #tpu.memory_space<vmem>>, vector<8x32xf32>
    %c0_23 = arith.constant 0 : index
    %c128 = arith.constant 128 : index
    %28 = vector.load %arg11[%c0_23, %c128] : memref<8x512xf32, #tpu.memory_space<vmem>>, vector<8x32xf32>
    tpu.vector_store %arg11[%c0_23, %c128], %27 {strides = array<i32>} : memref<8x512xf32, #tpu.memory_space<vmem>>, vector<8x32xf32>,
    %c5 = arith.constant 5 : index
    %c0_24 = arith.constant 0 : index
    %29 = tpu.strided_load %arg10[%c5, %c0_24] {strides = array<i32: 16, 1>} : memref<128x32xf32, #tpu.memory_space<vmem>>, vector<8x32xf32>
    %c0_25 = arith.constant 0 : index
    %c160 = arith.constant 160 : index
    %30 = vector.load %arg11[%c0_25, %c160] : memref<8x512xf32, #tpu.memory_space<vmem>>, vector<8x32xf32>
    tpu.vector_store %arg11[%c0_25, %c160], %29 {strides = array<i32>} : memref<8x512xf32, #tpu.memory_space<vmem>>, vector<8x32xf32>,
    %c6 = arith.constant 6 : index
    %c0_26 = arith.constant 0 : index
    %31 = tpu.strided_load %arg10[%c6, %c0_26] {strides = array<i32: 16, 1>} : memref<128x32xf32, #tpu.memory_space<vmem>>, vector<8x32xf32>
    %c0_27 = arith.constant 0 : index
    %c192 = arith.constant 192 : index
    %32 = vector.load %arg11[%c0_27, %c192] : memref<8x512xf32, #tpu.memory_space<vmem>>, vector<8x32xf32>
    tpu.vector_store %arg11[%c0_27, %c192], %31 {strides = array<i32>} : memref<8x512xf32, #tpu.memory_space<vmem>>, vector<8x32xf32>,
    %c7 = arith.constant 7 : index
    %c0_28 = arith.constant 0 : index
    %33 = tpu.strided_load %arg10[%c7, %c0_28] {strides = array<i32: 16, 1>} : memref<128x32xf32, #tpu.memory_space<vmem>>, vector<8x32xf32>
    %c0_29 = arith.constant 0 : index
    %c224 = arith.constant 224 : index
    %34 = vector.load %arg11[%c0_29, %c224] : memref<8x512xf32, #tpu.memory_space<vmem>>, vector<8x32xf32>
    tpu.vector_store %arg11[%c0_29, %c224], %33 {strides = array<i32>} : memref<8x512xf32, #tpu.memory_space<vmem>>, vector<8x32xf32>,
    %c8 = arith.constant 8 : index
    %c0_30 = arith.constant 0 : index
    %35 = tpu.strided_load %arg10[%c8, %c0_30] {strides = array<i32: 16, 1>} : memref<128x32xf32, #tpu.memory_space<vmem>>, vector<8x32xf32>
    %c0_31 = arith.constant 0 : index
    %c256 = arith.constant 256 : index
    %36 = vector.load %arg11[%c0_31, %c256] : memref<8x512xf32, #tpu.memory_space<vmem>>, vector<8x32xf32>
    tpu.vector_store %arg11[%c0_31, %c256], %35 {strides = array<i32>} : memref<8x512xf32, #tpu.memory_space<vmem>>, vector<8x32xf32>,
    %c9 = arith.constant 9 : index
    %c0_32 = arith.constant 0 : index
    %37 = tpu.strided_load %arg10[%c9, %c0_32] {strides = array<i32: 16, 1>} : memref<128x32xf32, #tpu.memory_space<vmem>>, vector<8x32xf32>
    %c0_33 = arith.constant 0 : index
    %c288 = arith.constant 288 : index
    %38 = vector.load %arg11[%c0_33, %c288] : memref<8x512xf32, #tpu.memory_space<vmem>>, vector<8x32xf32>
    tpu.vector_store %arg11[%c0_33, %c288], %37 {strides = array<i32>} : memref<8x512xf32, #tpu.memory_space<vmem>>, vector<8x32xf32>,
    %c10 = arith.constant 10 : index
    %c0_34 = arith.constant 0 : index
    %39 = tpu.strided_load %arg10[%c10, %c0_34] {strides = array<i32: 16, 1>} : memref<128x32xf32, #tpu.memory_space<vmem>>, vector<8x32xf32>
    %c0_35 = arith.constant 0 : index
    %c320 = arith.constant 320 : index
    %40 = vector.load %arg11[%c0_35, %c320] : memref<8x512xf32, #tpu.memory_space<vmem>>, vector<8x32xf32>
    tpu.vector_store %arg11[%c0_35, %c320], %39 {strides = array<i32>} : memref<8x512xf32, #tpu.memory_space<vmem>>, vector<8x32xf32>,
    %c11 = arith.constant 11 : index
    %c0_36 = arith.constant 0 : index
    %41 = tpu.strided_load %arg10[%c11, %c0_36] {strides = array<i32: 16, 1>} : memref<128x32xf32, #tpu.memory_space<vmem>>, vector<8x32xf32>
    %c0_37 = arith.constant 0 : index
    %c352 = arith.constant 352 : index
    %42 = vector.load %arg11[%c0_37, %c352] : memref<8x512xf32, #tpu.memory_space<vmem>>, vector<8x32xf32>
    tpu.vector_store %arg11[%c0_37, %c352], %41 {strides = array<i32>} : memref<8x512xf32, #tpu.memory_space<vmem>>, vector<8x32xf32>,
    %c12 = arith.constant 12 : index
    %c0_38 = arith.constant 0 : index
    %43 = tpu.strided_load %arg10[%c12, %c0_38] {strides = array<i32: 16, 1>} : memref<128x32xf32, #tpu.memory_space<vmem>>, vector<8x32xf32>
    %c0_39 = arith.constant 0 : index
    %c384 = arith.constant 384 : index
    %44 = vector.load %arg11[%c0_39, %c384] : memref<8x512xf32, #tpu.memory_space<vmem>>, vector<8x32xf32>
    tpu.vector_store %arg11[%c0_39, %c384], %43 {strides = array<i32>} : memref<8x512xf32, #tpu.memory_space<vmem>>, vector<8x32xf32>,
    %c13 = arith.constant 13 : index
    %c0_40 = arith.constant 0 : index
    %45 = tpu.strided_load %arg10[%c13, %c0_40] {strides = array<i32: 16, 1>} : memref<128x32xf32, #tpu.memory_space<vmem>>, vector<8x32xf32>
    %c0_41 = arith.constant 0 : index
    %c416 = arith.constant 416 : index
    %46 = vector.load %arg11[%c0_41, %c416] : memref<8x512xf32, #tpu.memory_space<vmem>>, vector<8x32xf32>
    tpu.vector_store %arg11[%c0_41, %c416], %45 {strides = array<i32>} : memref<8x512xf32, #tpu.memory_space<vmem>>, vector<8x32xf32>,
    %c14 = arith.constant 14 : index
    %c0_42 = arith.constant 0 : index
    %47 = tpu.strided_load %arg10[%c14, %c0_42] {strides = array<i32: 16, 1>} : memref<128x32xf32, #tpu.memory_space<vmem>>, vector<8x32xf32>
    %c0_43 = arith.constant 0 : index
    %c448 = arith.constant 448 : index
    %48 = vector.load %arg11[%c0_43, %c448] : memref<8x512xf32, #tpu.memory_space<vmem>>, vector<8x32xf32>
    tpu.vector_store %arg11[%c0_43, %c448], %47 {strides = array<i32>} : memref<8x512xf32, #tpu.memory_space<vmem>>, vector<8x32xf32>,
    %c15 = arith.constant 15 : index
    %c0_44 = arith.constant 0 : index
    %49 = tpu.strided_load %arg10[%c15, %c0_44] {strides = array<i32: 16, 1>} : memref<128x32xf32, #tpu.memory_space<vmem>>, vector<8x32xf32>
    %c0_45 = arith.constant 0 : index
    %c480 = arith.constant 480 : index
    %50 = vector.load %arg11[%c0_45, %c480] : memref<8x512xf32, #tpu.memory_space<vmem>>, vector<8x32xf32>
    tpu.vector_store %arg11[%c0_45, %c480], %49 {strides = array<i32>} : memref<8x512xf32, #tpu.memory_space<vmem>>, vector<8x32xf32>,
    %c0_46 = arith.constant 0 : index
    %c0_47 = arith.constant 0 : index
    %51 = vector.load %arg11[%c0_46, %c0_47] : memref<8x512xf32, #tpu.memory_space<vmem>>, vector<8x512xf32>
    %c0_48 = arith.constant 0 : index
    %c0_49 = arith.constant 0 : index
    %52 = vector.load %arg5[%c0_48, %c0_49] : memref<512x128xf32, #tpu.memory_space<vmem>>, vector<512x128xf32>
    %cst_50 = arith.constant dense<0.000000e+00> : vector<8x128xf32>
    %53 = tpu.matmul %51, %52, %cst_50 {dimension_numbers = #tpu.dot_dimension_numbers<[1], [0], [0], [1], [0, 0, 1, 1], [], []>} : vector<8x512xf32>, vector<512x128xf32>, vector<8x128xf32> -> vector<8x128xf32>
    %c0_51 = arith.constant 0 : index
    %c0_52 = arith.constant 0 : index
    %54 = vector.load %arg2[%c0_51, %c0_52] : memref<8x192xbf16, #tpu.memory_space<vmem>>, vector<8x192xbf16>
    %c0_53 = arith.constant 0 : index
    %c0_54 = arith.constant 0 : index
    %55 = vector.load %arg6[%c0_53, %c0_54] : memref<192x128xbf16, #tpu.memory_space<vmem>>, vector<192x128xbf16>
    %cst_55 = arith.constant dense<0.000000e+00> : vector<8x128xf32>
    %56 = tpu.matmul %54, %55, %cst_55 {dimension_numbers = #tpu.dot_dimension_numbers<[1], [0], [0], [1], [0, 0, 1, 1], [], []>} : vector<8x192xbf16>, vector<192x128xbf16>, vector<8x128xf32> -> vector<8x128xf32>
    %57 = arith.addf %53, %56 : vector<8x128xf32>
    %c0_56 = arith.constant 0 : index
    %c0_57 = arith.constant 0 : index
    %58 = vector.load %arg8[%c0_56, %c0_57] : memref<1x128xf32, #tpu.memory_space<vmem>>, vector<1x128xf32>
    %59 = vector.broadcast %58 : vector<1x128xf32> to vector<8x128xf32>
    %60 = arith.addf %57, %59 : vector<8x128xf32>
    %61 = tpu.iota {dimensions = array<i32: 1>} : vector<8x128xi32>
    %c8_i32 = arith.constant 8 : i32
    %62 = vector.broadcast %c8_i32 : i32 to vector<8x128xi32>
    %63 = arith.cmpi sge, %61, %62 : vector<8x128xi32>
    %cst_58 = arith.constant -1.000000e+30 : f32
    %64 = vector.broadcast %cst_58 : f32 to vector<8x128xf32>
    %65 = arith.select %63, %60, %64 : vector<8x128xi1>, vector<8x128xf32>
    %cst_59 = arith.constant dense<0xFF800000> : vector<8xf32>
    %66 = vector.multi_reduction <maximumf>, %65, %cst_59 [1] : vector<8x128xf32> to vector<8xf32>
    %67 = vector.shape_cast %66 : vector<8xf32> to vector<8x1xf32>
    %68 = vector.broadcast %67 : vector<8x1xf32> to vector<8x128xf32>
    %69 = arith.subf %65, %68 : vector<8x128xf32>
    %70 = math.exp %69 : vector<8x128xf32>
    %cst_60 = arith.constant dense<0.000000e+00> : vector<8xf32>
    %71 = vector.multi_reduction <add>, %70, %cst_60 [1] : vector<8x128xf32> to vector<8xf32>
    %72 = vector.shape_cast %71 : vector<8xf32> to vector<8x1xf32>
    %73 = tpu.reciprocal %72 {approx = true} : vector<8x1xf32> -> vector<8x1xf32>
    %74 = vector.broadcast %73 : vector<8x1xf32> to vector<8x128xf32>
    %75 = arith.mulf %70, %74 : vector<8x128xf32>
    %c8_i32_61 = arith.constant 8 : i32
    %76 = vector.broadcast %c8_i32_61 : i32 to vector<8x128xi32>
    %77 = arith.cmpi slt, %61, %76 : vector<8x128xi32>
    %78 = arith.select %77, %60, %75 : vector<8x128xi1>, vector<8x128xf32>
    %c0_62 = arith.constant 0 : index
    %c0_63 = arith.constant 0 : index
    %79 = vector.load %arg9[%c0_62, %c0_63] : memref<8x128xf32, #tpu.memory_space<vmem>>, vector<8x128xf32>
    tpu.vector_store %arg9[%c0_62, %c0_63], %78 {strides = array<i32>} : memref<8x128xf32, #tpu.memory_space<vmem>>, vector<8x128xf32>,
    return
  }
  func.func @transform_0(%arg0: i32) -> (i32, i32) {
    %c0_i32 = arith.constant 0 : i32
    %c0_i32_0 = arith.constant 0 : i32
    return %arg0, %c0_i32 : i32, i32
  }
  func.func @transform_1(%arg0: i32) -> (i32, i32) {
    %c0_i32 = arith.constant 0 : i32
    %c0_i32_0 = arith.constant 0 : i32
    return %arg0, %c0_i32 : i32, i32
  }
  func.func @transform_2(%arg0: i32) -> (i32, i32) {
    %c0_i32 = arith.constant 0 : i32
    %c0_i32_0 = arith.constant 0 : i32
    %c0_i32_1 = arith.constant 0 : i32
    return %c0_i32, %c0_i32_0 : i32, i32
  }
  func.func @transform_3(%arg0: i32) -> (i32, i32) {
    %c0_i32 = arith.constant 0 : i32
    %c0_i32_0 = arith.constant 0 : i32
    %c0_i32_1 = arith.constant 0 : i32
    return %c0_i32, %c0_i32_0 : i32, i32
  }
  func.func @transform_4(%arg0: i32) -> (i32, i32) {
    %c0_i32 = arith.constant 0 : i32
    %c0_i32_0 = arith.constant 0 : i32
    %c0_i32_1 = arith.constant 0 : i32
    return %c0_i32, %c0_i32_0 : i32, i32
  }
  func.func @transform_5(%arg0: i32) -> (i32, i32) {
    %c0_i32 = arith.constant 0 : i32
    %c0_i32_0 = arith.constant 0 : i32
    %c0_i32_1 = arith.constant 0 : i32
    return %c0_i32, %c0_i32_0 : i32, i32
  }
  func.func @transform_6(%arg0: i32) -> i32 {
    %c0_i32 = arith.constant 0 : i32
    %c0_i32_0 = arith.constant 0 : i32
    return %c0_i32 : i32
  }
  func.func @transform_7(%arg0: i32) -> (i32, i32) {
    %c0_i32 = arith.constant 0 : i32
    %c0_i32_0 = arith.constant 0 : i32
    %c0_i32_1 = arith.constant 0 : i32
    return %c0_i32, %c0_i32_0 : i32, i32
  }
  func.func @transform_8(%arg0: i32) -> (i32, i32) {
    %c0_i32 = arith.constant 0 : i32
    %c0_i32_0 = arith.constant 0 : i32
    return %arg0, %c0_i32 : i32, i32
  }
}

</mosaic_0001>

<bundles_post_ra>
// kernel: payload_encoder_forward.1
= control target key start
LH: loop header
LB: loop body
LE: loop exit
PB: predicated region body
PF: predicated region fallthrough
CT: control target
= control target key end

     0   :  { %13 = vsyncpa [#allocation5], 0  ;;  %s1893_s0 = inlined_call_operand.vmem [shape: bf16[128,128], index: 0, kind: input, shape index: {}]   ;;  %s1894_s1 = inlined_call_operand.vmem [shape: bf16[8,192], index: 1, kind: input, shape index: {}]   ;;  %s1895_s2 = inlined_call_operand.vmem [shape: bf16[128,64], index: 2, kind: input, shape index: {}]   ;;  %s1896_s3 = inlined_call_operand.vmem [shape: bf16[64,32], index: 3, kind: input, shape index: {}]   ;;  %s1897_s4 = inlined_call_operand.vmem [shape: f32[512,128], index: 4, kind: input, shape index: {}]   ;;  %s1898_s5 = inlined_call_operand.hbm [shape: bf16[192,128], index: 5, kind: input, shape index: {}]   ;;  %s1899_s6 = inlined_call_operand.vmem [shape: f32[2], index: 6, kind: input, shape index: {}]   ;;  %s1900_s7 = inlined_call_operand.vmem [shape: f32[1,128], index: 7, kind: input, shape index: {}]   ;;  %s1901_s8 = inlined_call_operand.vmem [shape: f32[8,128], index: 8, kind: output, shape index: {}]  }
   0x1   :  { %14 = vsyncpa [#allocation6], 0  ;;  %s1453_s27 = smov [#allocation4]   ;;  %s43_s9 = sshll.u32 %s1899_s6, 4  ;;  %s44_s9 = int_to_ptr.vmem [resolvable:$true] %s43_s9 }
   0x2   :  { %s30_s28 = sshll.u32 %s1453_s27, 4  ;;  %s1415_s12 = scalar_lea.hbm %s1898_s5, 1536  ;;  %s31_s28 = int_to_ptr.vmem [resolvable:$true] %s30_s28 }
   0x3   :  { %p1416_p0 = scmp.ne.s32.totalorder %s1898_s5, %s1415_s12  ;;  %p1419_p1 = scmp.lt.u32.totalorder %s1415_s12, %s1898_s5 }
   0x5   :  { %p1421_p2 = pnand %p1419_p1, %p1416_p0 }
   0x7   :  { %1424 = shalt.err (!%p1421_p2)
}
   0x8   :  { %s1425_s17 = scalar_lea.vmem %s31_s28, 1536  ;;  %p1430_p4 = scmp.lt.s32.totalorder %s31_s28, %s31_s28 }
   0x9   :  { %p1426_p3 = scmp.ne.s32.totalorder %s31_s28, %s1425_s17  ;;  %p1431_p5 = scmp.lt.s32.totalorder %s1425_s17, %s1425_s17 }
   0xb   :  { %p1432_p6 = por %p1431_p5, %p1430_p4 }
   0xd   :  { %p1433_p7 = pnand %p1432_p6, %p1426_p3 }
   0xf   :  { %1436 = shalt.err (!%p1433_p7)
}
  0x10   :  { %s1454_s6 = smov 64   ;;  %s1455_s18 = smov 4  }
  0x11   :  { %36 = dma.hbm_to_vmem [thread:$0]  %s1898_s5, 1536, %s31_s28, [#allocation5], %s1454_s6, %s1454_s6, %s1455_s18  }
  0x12   :  { %s1437_s21 = scalar_lea.vmem %s44_s9, 16  ;;  %p1442_p9 = scmp.lt.s32.totalorder %s44_s9, %s44_s9 }
  0x13   :  { %p1438_p8 = scmp.ne.s32.totalorder %s44_s9, %s1437_s21  ;;  %p1443_p10 = scmp.lt.s32.totalorder %s1437_s21, %s1437_s21 }
  0x15   :  { %p1444_p11 = por %p1443_p10, %p1442_p9 }
  0x17   :  { %p1445_p12 = pnand %p1444_p11, %p1438_p8 }
  0x19   :  { %1448 = shalt.err (!%p1445_p12)
}
  0x1a   :  { %s1456_s22 = smov [#allocation7]  }
  0x1b   :  { %46 = dma.vmem_to_smem %s44_s9, 16, %s1456_s22, [#allocation6]  }
  0x1c   :  { %1449 = dma.done.wait [#allocation5], 1536  }
  0x1d   :  { %1450 = vsyncadd [#allocation5], 4294965760 }
  0x1e   :  { %1451 = dma.done.wait [#allocation6], 16  }
  0x1f   :  { %1452 = vsyncadd [#allocation6], 4294967280 }
  0x20   :  { %55 = sfence }
  0x21   :  { %v1377_v0 = vld [vmem:[%s1895_s2] sm:$0xff]   ;;  %v1378_v1 = vld [vmem:[%s1895_s2 + $0x8] sm:$0xff]   ;;  %v1379_v2 = vld [vmem:[%s1895_s2 + $0x10] sm:$0xff]   ;;  %vm358_vm0 = vcmask 523264   ;;  %s1123_s21 = sld [smem:[#allocation7 + $0x1]]  ;;  %vm512_vm1 = vcmask 261120  }
  0x22   :  { %1250 = vmatprep.subr.bf16.mxu0 %v1377_v0  ;;  %v1380_v3 = vld [vmem:[%s1895_s2 + $0x18] sm:$0xff]   ;;  %v1385_v4 = vld [vmem:[%s1893_s0] sm:$0xff]   ;;  %v1382_v6 = vld [vmem:[%s1895_s2 + $0x28] sm:$0xff]   ;;  %s1459_s29 = smov 96   ;;  %vm549_vm2 = vcmask 523520   ;;  %vm563_vm3 = vcmask 785920  }
  0x23   :  { %1251 = vmatpush3.bf16.msra.mxu0 %v1377_v0  ;;  %1266 = vmatprep.mubr.bf16.mxu0 %v1385_v4  ;;  %v1381_v5 = vld [vmem:[%s1895_s2 + $0x20] sm:$0xff]   ;;  %v1383_v8 = vld [vmem:[%s1895_s2 + $0x30] sm:$0xff]   ;;  %v1384_v9 = vld [vmem:[%s1895_s2 + $0x38] sm:$0xff]   ;;  %s1458_s2 = smov 32   ;;  %vm577_vm4 = vcmask 1048320  }
  0x24   :  { %1252 = vmatprep.subr.bf16.mxu0 %v1378_v1  ;;  %v1393_v7 = vld [vmem:[%s1896_s3] sm:$0xff]   ;;  %v1386_v10 = vld [vmem:[%s1893_s0 + $0x8] sm:$0xff]   ;;  %v1387_v11 = vld [vmem:[%s1893_s0 + $0x10] sm:$0xff]  }
  0x25   :  { %1282 = vmatprep.subr.bf16.mxu1 %v1393_v7  ;;  %v1388_v12 = vld [vmem:[%s1893_s0 + $0x18] sm:$0xff]   ;;  %v1389_v13 = vld [vmem:[%s1893_s0 + $0x20] sm:$0xff]   ;;  %v1390_v14 = vld [vmem:[%s1893_s0 + $0x28] sm:$0xff]  }
  0x26   :  { %1283 = vmatpush3.bf16.msra.mxu1 %v1393_v7  ;;  %v1391_v15 = vld [vmem:[%s1893_s0 + $0x30] sm:$0xff]   ;;  %v1392_v16 = vld [vmem:[%s1893_s0 + $0x38] sm:$0xff]   ;;  %v1394_v17 = vld [vmem:[%s1896_s3 + $0x8] sm:$0xff]   ;;  %s89_s0 = sld [smem:[#allocation7]] }
  0x27   :  { %1253 = vmatpush3.bf16.msra.mxu0 %v1378_v1  ;;  %1284 = vmatprep.subr.bf16.mxu1 %v1394_v17  ;;  %v1395_v18 = vld [vmem:[%s1896_s3 + $0x10] sm:$0xff]   ;;  %v1396_v19 = vld [vmem:[%s1896_s3 + $0x18] sm:$0xff]  }
  0x28   :  { %1254 = vmatprep.subr.bf16.mxu0 %v1379_v2 }
  0x2a   :  { %1285 = vmatpush3.bf16.msra.mxu1 %v1394_v17 }
  0x2b   :  { %1255 = vmatpush3.bf16.msra.mxu0 %v1379_v2  ;;  %1286 = vmatprep.subr.bf16.mxu1 %v1395_v18 }
  0x2c   :  { %1256 = vmatprep.subr.bf16.mxu0 %v1380_v3  ;;  %v1582_v20 = vstv %s89_s0 }
  0x2e   :  { %1287 = vmatpush3.bf16.msra.mxu1 %v1395_v18 }
  0x2f   :  { %1257 = vmatpush3.bf16.msra.mxu0 %v1380_v3  ;;  %1288 = vmatprep.subr.bf16.mxu1 %v1396_v19 }
  0x30   :  { %1258 = vmatprep.subr.bf16.mxu0 %v1381_v5 }
  0x32   :  { %1289 = vmatpush3.bf16.msra.mxu1 %v1396_v19 }
  0x33   :  { %1259 = vmatpush3.bf16.msra.mxu0 %v1381_v5 }
  0x34   :  { %1260 = vmatprep.subr.bf16.mxu0 %v1382_v6 }
  0x37   :  { %1261 = vmatpush3.bf16.msra.mxu0 %v1382_v6 }
  0x38   :  { %1262 = vmatprep.subr.bf16.mxu0 %v1383_v8 }
  0x3b   :  { %1263 = vmatpush3.bf16.msra.mxu0 %v1383_v8 }
  0x3c   :  { %1264 = vmatprep.subr.bf16.mxu0 %v1384_v9 }
  0x3f   :  { %1265 = vmatpush3.bf16.msra.mxu0 %v1384_v9 }
  0x42   :  { %1267 = vmatmul.mubr.bf16.vlgmr.msra.gmra.mrb[0].mxu0 %v1386_v10 }
  0x43   :  { %1270 = vmatprep.mubr.bf16.mxu0 %v1387_v11 }
  0x4a   :  { %1271 = vmatmul.mubr.bf16.gmra.mrb[4].mxu0 %v1388_v12 }
  0x4b   :  { %1274 = vmatprep.mubr.bf16.mxu0 %v1389_v13 }
  0x52   :  { %1275 = vmatmul.mubr.bf16.gmra.mrb[8].mxu0 %v1390_v14 }
  0x53   :  { %1278 = vmatprep.mubr.bf16.mxu0 %v1391_v15 }
  0x5a   :  { %1279 = vmatmul.mubr.bf16.gmra.mrb[12].mxu0 %v1392_v16 }
 0x115   :  { %v1268_v21 = vpop.f32.mrb[0].mxu0 }
 0x116   :  { %v230_v22 = vadd.f32 %v1268_v21, %v1582_v20  ;;  %v221_v23 = vpop.f32.mrb[1].mxu0 }
 0x117   :  { %v222_v24 = vadd.f32 %v221_v23, %v1582_v20  ;;  %v1269_v25 = vpop.f32.mrb[2].mxu0 }
 0x118   :  { %v286_v26 = vmul.f32 0.01, %v230_v22  ;;  %v233_v27 = vadd.f32 %v1269_v25, %v1582_v20  ;;  %v224_v28 = vpop.f32.mrb[3].mxu0 }
 0x119   :  { %v284_v29 = vmul.f32 0.01, %v222_v24  ;;  %v225_v30 = vadd.f32 %v224_v28, %v1582_v20 }
 0x11a   :  { %v287_v31 = vmul.f32 0.01, %v233_v27  ;;  %v302_v33 = vmax.f32 %v230_v22, %v286_v26 }
 0x11b   :  { %v285_v32 = vmul.f32 0.01, %v225_v30  ;;  %v300_v35 = vmax.f32 %v222_v24, %v284_v29 }
 0x11c   :  { %v303_v34 = vmax.f32 %v233_v27, %v287_v31  ;;  %v1457_v31 = vmov 0  }
 0x11d   :  { %v301_v36 = vmax.f32 %v225_v30, %v285_v32  ;;  %v1272_v37 = vpop.f32.mrb[4].mxu0  ;;  %v1397_v30 = vld [vmem:[#allocation4] sm:$0xff]   ;;  %897 = vmatprep.subr.bf16.mxu1 %v1457_v31 }
 0x11e   :  { %v317_v38 = vpack.c.bf16 %v303_v34, %v302_v33  ;;  %v246_v39 = vadd.f32 %v1272_v37, %v1582_v20  ;;  %v237_v40 = vpop.f32.mrb[5].mxu0  ;;  %v743_v32 = vld [vmem:[%s1897_s4 + $0x80] sm:$0xff]  ;;  %v744_v33 = vld [vmem:[%s1897_s4 + $0x88] sm:$0xff]  ;;  %v745_v37 = vld [vmem:[%s1897_s4 + $0x90] sm:$0xff] }
 0x11f   :  { %v238_v41 = vadd.f32 %v237_v40, %v1582_v20  ;;  %v1273_v42 = vpop.f32.mrb[6].mxu0  ;;  %v316_v43 = vpack.c.bf16 %v301_v36, %v300_v35  ;;  %v1306_v34 = vpack.c.bf16 %v744_v33, %v743_v32  ;;  %v727_v35 = vld [vmem:[%s1897_s4] sm:$0xff]  ;;  %v728_v36 = vld [vmem:[%s1897_s4 + $0x8] sm:$0xff]  ;;  %v729_v40 = vld [vmem:[%s1897_s4 + $0x10] sm:$0xff] }
 0x120   :  { %v290_v44 = vmul.f32 0.01, %v246_v39  ;;  %v249_v45 = vadd.f32 %v1273_v42, %v1582_v20  ;;  %v240_v46 = vpop.f32.mrb[7].mxu0  ;;  %v730_v42 = vld [vmem:[%s1897_s4 + $0x18] sm:$0xff] }
 0x121   :  { %v288_v47 = vmul.f32 0.01, %v238_v41  ;;  %v241_v48 = vadd.f32 %v240_v46, %v1582_v20  ;;  %1290 = vmatprep.mubr.msk.bf16.mxu1 %vm358_vm0, %v316_v43  ;;  %1307 = vmatprep.subr.bf16.mxu0 %v1306_v34  ;;  %v747_v43 = vld [vmem:[%s1897_s4 + $0xa0] sm:$0xff]  ;;  %v1399_v46 = vld [vmem:[#allocation4 + $0x10] sm:$0xff]  }
 0x122   :  { %v291_v49 = vmul.f32 0.01, %v249_v45  ;;  %1291 = vmatmul.mubr.msk.bf16.vlgmr.msra.gmra.mrb[0].mxu1 %vm358_vm0, %v317_v38  ;;  %v306_v51 = vmax.f32 %v246_v39, %v290_v44  ;;  %v1308_v38 = vpack.c.bf16 %v728_v36, %v727_v35  ;;  %v746_v39 = vld [vmem:[%s1897_s4 + $0x98] sm:$0xff]  ;;  %v748_v44 = vld [vmem:[%s1897_s4 + $0xa8] sm:$0xff] }
 0x123   :  { %v289_v50 = vmul.f32 0.01, %v241_v48  ;;  %v304_v53 = vmax.f32 %v238_v41, %v288_v47  ;;  %898 = vmatpush1.bf16.msra.mxu1 %v1397_v30  ;;  %v1310_v41 = vpack.c.bf16 %v746_v39, %v745_v37  ;;  %v1314_v47 = vpack.c.bf16 %v748_v44, %v747_v43 }
 0x124   :  { %v307_v52 = vmax.f32 %v249_v45, %v291_v49  ;;  %899 = vmatprep.subr.bf16.mxu1 %v1457_v31  ;;  %1309 = vmatpush3.bf16.msra.mxu0 %v1308_v38  ;;  %v1312_v45 = vpack.c.bf16 %v730_v42, %v729_v40  ;;  %v732_v49 = vld [vmem:[%s1897_s4 + $0x28] sm:$0xff] }
 0x125   :  { %v305_v54 = vmax.f32 %v241_v48, %v289_v50  ;;  %v1276_v55 = vpop.f32.mrb[8].mxu0  ;;  %1311 = vmatprep.subr.bf16.mxu0 %v1310_v41  ;;  %v731_v48 = vld [vmem:[%s1897_s4 + $0x20] sm:$0xff]  ;;  %v749_v50 = vld [vmem:[%s1897_s4 + $0xb0] sm:$0xff] }
 0x126   :  { %v319_v56 = vpack.c.bf16 %v307_v52, %v306_v51  ;;  %v262_v57 = vadd.f32 %v1276_v55, %v1582_v20  ;;  %v253_v58 = vpop.f32.mrb[9].mxu0  ;;  %v750_v51 = vld [vmem:[%s1897_s4 + $0xb8] sm:$0xff]  ;;  %v1316_v52 = vpack.c.bf16 %v732_v49, %v731_v48  ;;  %v733_v55 = vld [vmem:[%s1897_s4 + $0x30] sm:$0xff] }
 0x127   :  { %v318_v59 = vpack.c.bf16 %v305_v54, %v304_v53  ;;  %v254_v60 = vadd.f32 %v253_v58, %v1582_v20  ;;  %v1277_v61 = vpop.f32.mrb[10].mxu0  ;;  %v1400_v53 = vld [vmem:[#allocation4 + $0x18] sm:$0xff]   ;;  %v1318_v54 = vpack.c.bf16 %v750_v51, %v749_v50  ;;  %v1401_v58 = vld [vmem:[#allocation4 + $0x20] sm:$0xff]  }
 0x128   :  { %v294_v62 = vmul.f32 0.01, %v262_v57  ;;  %v265_v63 = vadd.f32 %v1277_v61, %v1582_v20  ;;  %v256_v0 = vpop.f32.mrb[11].mxu0  ;;  %1313 = vmatpush3.bf16.msra.mxu0 %v1312_v45  ;;  %v1664_v61 = vstv %s1123_s21 }
 0x129   :  { %v292_v1 = vmul.f32 0.01, %v254_v60  ;;  %v257_v2 = vadd.f32 %v256_v0, %v1582_v20  ;;  %1294 = vmatprep.mubr.msk.bf16.mxu1 %vm358_vm0, %v318_v59  ;;  %1315 = vmatprep.subr.bf16.mxu0 %v1314_v47  ;;  %v1402_v59 = vld [vmem:[#allocation4 + $0x28] sm:$0xff]  }
 0x12a   :  { %v295_v3 = vmul.f32 0.01, %v265_v63  ;;  %1295 = vmatmul.mubr.msk.bf16.gmra.mrb[4].mxu1 %vm358_vm0, %v319_v56  ;;  %v310_v5 = vmax.f32 %v262_v57, %v294_v62  ;;  %v734_v56 = vld [vmem:[%s1897_s4 + $0x38] sm:$0xff] }
 0x12b   :  { %v293_v4 = vmul.f32 0.01, %v257_v2  ;;  %v308_v7 = vmax.f32 %v254_v60, %v292_v1  ;;  %v1320_v57 = vpack.c.bf16 %v734_v56, %v733_v55  ;;  %v1403_v60 = vld [vmem:[#allocation4 + $0x30] sm:$0xff]  }
 0x12c   :  { %v311_v6 = vmax.f32 %v265_v63, %v295_v3  ;;  %1317 = vmatpush3.bf16.msra.mxu0 %v1316_v52 }
 0x12d   :  { %v309_v8 = vmax.f32 %v257_v2, %v293_v4  ;;  %v1280_v9 = vpop.f32.mrb[12].mxu0  ;;  %1319 = vmatprep.subr.bf16.mxu0 %v1318_v54 }
 0x12e   :  { %v321_v10 = vpack.c.bf16 %v311_v6, %v310_v5  ;;  %v278_v11 = vadd.f32 %v1280_v9, %v1582_v20  ;;  %v269_v12 = vpop.f32.mrb[13].mxu0 }
 0x12f   :  { %v320_v13 = vpack.c.bf16 %v309_v8, %v308_v7  ;;  %v270_v14 = vadd.f32 %v269_v12, %v1582_v20  ;;  %v1281_v15 = vpop.f32.mrb[14].mxu0 }
 0x130   :  { %v298_v16 = vmul.f32 0.01, %v278_v11  ;;  %v281_v17 = vadd.f32 %v1281_v15, %v1582_v20  ;;  %v272_v18 = vpop.f32.mrb[15].mxu0  ;;  %1321 = vmatpush3.bf16.msra.mxu0 %v1320_v57 }
 0x131   :  { %v296_v19 = vmul.f32 0.01, %v270_v14  ;;  %v273_v21 = vadd.f32 %v272_v18, %v1582_v20  ;;  %1298 = vmatprep.mubr.msk.bf16.mxu1 %vm358_vm0, %v320_v13  ;;  %v1398_v20 = vld [vmem:[#allocation4 + $0x8] sm:$0xff]  }
 0x132   :  { %v299_v22 = vmul.f32 0.01, %v281_v17  ;;  %1299 = vmatmul.mubr.msk.bf16.gmra.mrb[8].mxu1 %vm358_vm0, %v321_v10  ;;  %v314_v24 = vmax.f32 %v278_v11, %v298_v16 }
 0x133   :  { %v297_v23 = vmul.f32 0.01, %v273_v21  ;;  %v312_v26 = vmax.f32 %v270_v14, %v296_v19  ;;  %900 = vmatpush1.bf16.msra.mxu1 %v1398_v20 }
 0x134   :  { %v315_v25 = vmax.f32 %v281_v17, %v299_v22  ;;  %901 = vmatprep.subr.bf16.mxu1 %v1457_v31 }
 0x135   :  { %v313_v27 = vmax.f32 %v273_v21, %v297_v23 }
 0x136   :  { %v323_v28 = vpack.c.bf16 %v315_v25, %v314_v24 }
 0x137   :  { %v322_v29 = vpack.c.bf16 %v313_v27, %v312_v26  ;;  %902 = vmatpush1.bf16.msra.mxu1 %v1399_v46 }
 0x138   :  { %903 = vmatprep.subr.bf16.mxu1 %v1457_v31 }
 0x139   :  { %1302 = vmatprep.mubr.msk.bf16.mxu1 %vm358_vm0, %v322_v29 }
 0x13a   :  { %1303 = vmatmul.mubr.msk.bf16.gmra.mrb[12].mxu1 %vm358_vm0, %v323_v28 }
 0x13b   :  { %904 = vmatpush1.bf16.msra.mxu1 %v1400_v53 }
 0x13c   :  { %905 = vmatprep.subr.bf16.mxu1 %v1457_v31 }
 0x13f   :  { %906 = vmatpush1.bf16.msra.mxu1 %v1401_v58 }
 0x140   :  { %907 = vmatprep.subr.bf16.mxu1 %v1457_v31 }
 0x143   :  { %908 = vmatpush1.bf16.msra.mxu1 %v1402_v59  ;;  %v751_v59 = vld [vmem:[%s1897_s4 + $0xc0] sm:$0xff] }
 0x144   :  { %909 = vmatprep.subr.bf16.mxu1 %v1457_v31 }
 0x147   :  { %910 = vmatpush1.bf16.msra.mxu1 %v1403_v60 }
 0x148   :  { %911 = vmatprep.subr.bf16.mxu1 %v1457_v31 }
 0x1f5   :  { %v1292_v62 = vpop.f32.mrb[0].mxu1 }
 0x1f6   :  { %v426_v63 = vadd.f32 %v1292_v62, %v1664_v61  ;;  %v417_v0 = vpop.f32.mrb[1].mxu1 }
 0x1f7   :  { %v418_v1 = vadd.f32 %v417_v0, %v1664_v61  ;;  %v1293_v2 = vpop.f32.mrb[2].mxu1 }
 0x1f8   :  { %v482_v3 = vmul.f32 0.01, %v426_v63  ;;  %v429_v4 = vadd.f32 %v1293_v2, %v1664_v61  ;;  %v420_v5 = vpop.f32.mrb[3].mxu1 }
 0x1f9   :  { %v480_v6 = vmul.f32 0.01, %v418_v1  ;;  %v421_v7 = vadd.f32 %v420_v5, %v1664_v61 }
 0x1fa   :  { %v498_v8 = vmax.f32 %v426_v63, %v482_v3  ;;  %v483_v9 = vmul.f32 0.01, %v429_v4  ;;  %v752_v63 = vld [vmem:[%s1897_s4 + $0xc8] sm:$0xff] }
 0x1fb   :  { %v496_v10 = vmax.f32 %v418_v1, %v480_v6  ;;  %v481_v11 = vmul.f32 0.01, %v421_v7  ;;  %v1322_v1 = vpack.c.bf16 %v752_v63, %v751_v59 }
 0x1fc   :  { %515 = vst.msk [vmem:[#allocation2 + $0x10] sm:$0xff] %vm512_vm1, %v498_v8  ;;  %v499_v12 = vmax.f32 %v429_v4, %v483_v9 }
 0x1fd   :  { %513 = vst.msk [vmem:[#allocation2] sm:$0xff] %vm512_vm1, %v496_v10  ;;  %v497_v13 = vmax.f32 %v421_v7, %v481_v11  ;;  %v1296_v14 = vpop.f32.mrb[4].mxu1  ;;  %1323 = vmatprep.subr.bf16.mxu0 %v1322_v1 }
 0x1fe   :  { %516 = vst.msk [vmem:[#allocation2 + $0x18] sm:$0xff] %vm512_vm1, %v499_v12  ;;  %v442_v15 = vadd.f32 %v1296_v14, %v1664_v61  ;;  %v433_v16 = vpop.f32.mrb[5].mxu1 }
 0x1ff   :  { %514 = vst.msk [vmem:[#allocation2 + $0x8] sm:$0xff] %vm512_vm1, %v497_v13  ;;  %v434_v17 = vadd.f32 %v433_v16, %v1664_v61  ;;  %v1297_v18 = vpop.f32.mrb[6].mxu1 }
 0x200   :  { %v486_v19 = vmul.f32 0.01, %v442_v15  ;;  %v445_v21 = vadd.f32 %v1297_v18, %v1664_v61  ;;  %v436_v22 = vpop.f32.mrb[7].mxu1 }
 0x201   :  { %v484_v23 = vmul.f32 0.01, %v434_v17  ;;  %v437_v24 = vadd.f32 %v436_v22, %v1664_v61 }
 0x202   :  { %v502_v25 = vmax.f32 %v442_v15, %v486_v19  ;;  %v487_v26 = vmul.f32 0.01, %v445_v21 }
 0x203   :  { %v500_v27 = vmax.f32 %v434_v17, %v484_v23  ;;  %v485_v28 = vmul.f32 0.01, %v437_v24 }
 0x204   :  { %519 = vst.msk [vmem:[#allocation2 + $0x30] sm:$0xff] %vm512_vm1, %v502_v25  ;;  %v503_v29 = vmax.f32 %v445_v21, %v487_v26  ;;  %v602_v4 = vld [vmem:[#allocation2 + $0x6] ss:$16 sm:$0x3] }
 0x205   :  { %517 = vst.msk [vmem:[#allocation2 + $0x20] sm:$0xff] %vm512_vm1, %v500_v27  ;;  %v501_v30 = vmax.f32 %v437_v24, %v485_v28  ;;  %v1300_v20 = vpop.f32.mrb[8].mxu1  ;;  %v589_v5 = vld [vmem:[#allocation2 + $0x5] ss:$16 sm:$0x3] }
 0x206   :  { %520 = vst.msk [vmem:[#allocation2 + $0x38] sm:$0xff] %vm512_vm1, %v503_v29  ;;  %v458_v32 = vadd.f32 %v1300_v20, %v1664_v61  ;;  %v449_v33 = vpop.f32.mrb[9].mxu1  ;;  %v552_v10 = vld [vmem:[#allocation2 + $0x2] ss:$16 sm:$0x3] }
 0x207   :  { %518 = vst.msk [vmem:[#allocation2 + $0x28] sm:$0xff] %vm512_vm1, %v501_v30  ;;  %v450_v34 = vadd.f32 %v449_v33, %v1664_v61  ;;  %v1301_v35 = vpop.f32.mrb[10].mxu1  ;;  %v538_v12 = vld [vmem:[#allocation2 + $0x1] ss:$16 sm:$0x3] }
 0x208   :  { %v490_v36 = vmul.f32 0.01, %v458_v32  ;;  %v461_v37 = vadd.f32 %v1301_v35, %v1664_v61  ;;  %v452_v38 = vpop.f32.mrb[11].mxu1  ;;  %v566_v20 = vld [vmem:[#allocation2 + $0x3] ss:$16 sm:$0x3] }
 0x209   :  { %v488_v39 = vmul.f32 0.01, %v450_v34  ;;  %v453_v40 = vadd.f32 %v452_v38, %v1664_v61 }
 0x20a   :  { %v506_v41 = vmax.f32 %v458_v32, %v490_v36  ;;  %v491_v42 = vmul.f32 0.01, %v461_v37  ;;  %v615_v32 = vld [vmem:[#allocation2 + $0x7] ss:$16 sm:$0x3] }
 0x20b   :  { %v504_v43 = vmax.f32 %v450_v34, %v488_v39  ;;  %v489_v44 = vmul.f32 0.01, %v453_v40  ;;  %v637_v39 = vld [vmem:[#allocation2 + $0x9] ss:$16 sm:$0x3] }
 0x20c   :  { %523 = vst.msk [vmem:[#allocation2 + $0x50] sm:$0xff] %vm512_vm1, %v506_v41  ;;  %v507_v45 = vmax.f32 %v461_v37, %v491_v42  ;;  %v590_v3 = vld [vmem:[#allocation2 + $0x5] ss:$16 sm:$0xc] }
 0x20d   :  { %521 = vst.msk [vmem:[#allocation2 + $0x40] sm:$0xff] %vm512_vm1, %v504_v43  ;;  %v505_v46 = vmax.f32 %v453_v40, %v489_v44  ;;  %v1304_v47 = vpop.f32.mrb[12].mxu1  ;;  %v591_v9 = vor.u32 %v590_v3, %v589_v5  ;;  %v553_v11 = vld [vmem:[#allocation2 + $0x2] ss:$16 sm:$0xc]  ;;  %v736_v3 = vld [vmem:[%s1897_s4 + $0x48] sm:$0xff] }
 0x20e   :  { %524 = vst.msk [vmem:[#allocation2 + $0x58] sm:$0xff] %vm512_vm1, %v507_v45  ;;  %v474_v48 = vadd.f32 %v1304_v47, %v1664_v61  ;;  %v465_v49 = vpop.f32.mrb[13].mxu1  ;;  %v539_v13 = vld [vmem:[#allocation2 + $0x1] ss:$16 sm:$0xc]  ;;  %v554_v23 = vor.u32 %v553_v11, %v552_v10 }
 0x20f   :  { %522 = vst.msk [vmem:[#allocation2 + $0x48] sm:$0xff] %vm512_vm1, %v505_v46  ;;  %v466_v50 = vadd.f32 %v465_v49, %v1664_v61  ;;  %v1305_v51 = vpop.f32.mrb[14].mxu1  ;;  %v540_v24 = vor.u32 %v539_v13, %v538_v12  ;;  %v567_v25 = vld [vmem:[#allocation2 + $0x3] ss:$16 sm:$0xc] }
 0x210   :  { %v494_v52 = vmul.f32 0.01, %v474_v48  ;;  %v477_v53 = vadd.f32 %v1305_v51, %v1664_v61  ;;  %v468_v54 = vpop.f32.mrb[15].mxu1  ;;  %v616_v26 = vld [vmem:[#allocation2 + $0x7] ss:$16 sm:$0xc]  ;;  %v568_v37 = vor.u32 %v567_v25, %v566_v20 }
 0x211   :  { %v492_v55 = vmul.f32 0.01, %v466_v50  ;;  %v469_v56 = vadd.f32 %v468_v54, %v1664_v61  ;;  %v603_v61 = vld [vmem:[#allocation2 + $0x6] ss:$16 sm:$0xc]  ;;  %v617_v38 = vor.u32 %v616_v26, %v615_v32 }
 0x212   :  { %v510_v57 = vmax.f32 %v474_v48, %v494_v52  ;;  %v495_v58 = vmul.f32 0.01, %v477_v53  ;;  %v604_v8 = vor.u32 %v603_v61, %v602_v4  ;;  %v638_v40 = vld [vmem:[#allocation2 + $0x9] ss:$16 sm:$0xc]  ;;  %v735_v61 = vld [vmem:[%s1897_s4 + $0x40] sm:$0xff] }
 0x213   :  { %v508_v60 = vmax.f32 %v466_v50, %v492_v55  ;;  %v493_v62 = vmul.f32 0.01, %v469_v56  ;;  %v686_v41 = vld [vmem:[#allocation2 + $0xd] ss:$16 sm:$0xc]  ;;  %v737_v32 = vld [vmem:[%s1897_s4 + $0x50] sm:$0xff] }
 0x214   :  { %527 = vst.msk [vmem:[#allocation2 + $0x70] sm:$0xff] %vm512_vm1, %v510_v57  ;;  %v511_v0 = vmax.f32 %v477_v53, %v495_v58  ;;  %v605_v6 = vld [vmem:[#allocation2 + $0x6] ss:$16 sm:$0x30]  ;;  %v639_v53 = vor.u32 %v638_v40, %v637_v39  ;;  %v1406_v39 = vld [vmem:[#allocation4 + $0x48] sm:$0xff]  }
 0x215   :  { %525 = vst.msk [vmem:[#allocation2 + $0x60] sm:$0xff] %vm512_vm1, %v508_v60  ;;  %v509_v2 = vmax.f32 %v469_v56, %v493_v62  ;;  %v592_v7 = vld [vmem:[#allocation2 + $0x5] ss:$16 sm:$0x30]  ;;  %v606_v14 = vor.u32 %v605_v6, %v604_v8  ;;  %v1324_v6 = vpack.c.bf16 %v736_v3, %v735_v61  ;;  %v758_v61 = vld [vmem:[%s1897_s4 + $0xf8] sm:$0xff] }
 0x216   :  { %528 = vst.msk [vmem:[#allocation2 + $0x78] sm:$0xff] %vm512_vm1, %v511_v0  ;;  %v593_v15 = vor.u32 %v592_v7, %v591_v9  ;;  %v555_v16 = vld [vmem:[#allocation2 + $0x2] ss:$16 sm:$0x30] }
 0x217   :  { %526 = vst.msk [vmem:[#allocation2 + $0x68] sm:$0xff] %vm512_vm1, %v509_v2  ;;  %v541_v17 = vld [vmem:[#allocation2 + $0x1] ss:$16 sm:$0x30]  ;;  %v556_v29 = vor.u32 %v555_v16, %v554_v23  ;;  %v1404_v2 = vld [vmem:[#allocation4 + $0x38] sm:$0xff]   ;;  %1325 = vmatpush3.bf16.msra.mxu0 %v1324_v6 }
 0x218   :  { %v542_v30 = vor.u32 %v541_v17, %v540_v24  ;;  %v569_v33 = vld [vmem:[#allocation2 + $0x3] ss:$16 sm:$0x30]  ;;  %v618_v34 = vld [vmem:[#allocation2 + $0x7] ss:$16 sm:$0x30]  ;;  %912 = vmatpush1.bf16.msra.mxu1 %v1404_v2 }
 0x219   :  { %v640_v44 = vld [vmem:[#allocation2 + $0x9] ss:$16 sm:$0x30]  ;;  %v685_v45 = vld [vmem:[#allocation2 + $0xd] ss:$16 sm:$0x3]  ;;  %v570_v47 = vor.u32 %v569_v33, %v568_v37  ;;  %v619_v48 = vor.u32 %v618_v34, %v617_v38  ;;  %913 = vmatprep.subr.bf16.mxu1 %v1457_v31 }
 0x21a   :  { %v688_v46 = vld [vmem:[#allocation2 + $0xd] ss:$16 sm:$0x30]  ;;  %v651_v49 = vld [vmem:[#allocation2 + $0xa] ss:$16 sm:$0xc]  ;;  %v687_v60 = vor.u32 %v686_v41, %v685_v45  ;;  %v641_v9 = vor.u32 %v640_v44, %v639_v53 }
 0x21b   :  { %v1708_v50 = vld [vmem:[#allocation2 + $0xe] ss:$16 sm:$0xc]  ;;  %v581_v51 = vld [vmem:[#allocation2 + $0x4] ss:$16 sm:$0xc] }
 0x21c   :  { %v607_v18 = vld [vmem:[#allocation2 + $0x6] ss:$16 sm:$0xc0]  ;;  %v594_v19 = vld [vmem:[#allocation2 + $0x5] ss:$16 sm:$0xc0]  ;;  %v689_v10 = vor.u32 %v688_v46, %v687_v60 }
 0x21d   :  { %v608_v21 = vor.u32 %v607_v18, %v606_v14  ;;  %v595_v22 = vor.u32 %v594_v19, %v593_v15  ;;  %v557_v27 = vld [vmem:[#allocation2 + $0x2] ss:$16 sm:$0xc0]  ;;  %v543_v28 = vld [vmem:[#allocation2 + $0x1] ss:$16 sm:$0xc0] }
 0x21e   :  { %v558_v35 = vor.u32 %v557_v27, %v556_v29  ;;  %v544_v36 = vor.u32 %v543_v28, %v542_v30  ;;  %v571_v42 = vld [vmem:[#allocation2 + $0x3] ss:$16 sm:$0xc0]  ;;  %v620_v43 = vld [vmem:[#allocation2 + $0x7] ss:$16 sm:$0xc0] }
 0x21f   :  { %610 = vrot.lane.b32.xlu1 %v608_v21, %s1454_s6  ;;  %597 = vrot.lane.b32.xlu0 %v595_v22, %s1458_s2  ;;  %v583_v52 = vld [vmem:[#allocation2 + $0x4] ss:$16 sm:$0x30]  ;;  %v642_v54 = vld [vmem:[#allocation2 + $0x9] ss:$16 sm:$0xc0]  ;;  %v572_v58 = vor.u32 %v571_v42, %v570_v47  ;;  %v621_v59 = vor.u32 %v620_v43, %v619_v48 }
 0x220   :  { %v690_v55 = vld [vmem:[#allocation2 + $0xd] ss:$16 sm:$0xc0]  ;;  %v585_v56 = vld [vmem:[#allocation2 + $0x4] ss:$16 sm:$0xc0]  ;;  %v643_v25 = vor.u32 %v642_v54, %v641_v9 }
 0x221   :  { %v580_v57 = vld [vmem:[#allocation2 + $0x4] ss:$16 sm:$0x3]  ;;  %v650_v62 = vld [vmem:[#allocation2 + $0xa] ss:$16 sm:$0x3]  ;;  %v691_v26 = vor.u32 %v690_v55, %v689_v10 }
 0x222   :  { %v653_v63 = vld [vmem:[#allocation2 + $0xa] ss:$16 sm:$0x30]  ;;  %v698_v0 = vld [vmem:[#allocation2 + $0xe] ss:$16 sm:$0x3]  ;;  %v582_v1 = vor.u32 %v581_v51, %v580_v57  ;;  %v652_v16 = vor.u32 %v651_v49, %v650_v62 }
 0x223   :  { %560 = vrot.lane.b32.xlu1 %v558_v35, %s1454_s6  ;;  %546 = vrot.lane.b32.xlu0 %v544_v36, %s1458_s2  ;;  %v701_v4 = vld [vmem:[#allocation2 + $0xe] ss:$16 sm:$0x30]  ;;  %v1716_v5 = vld [vmem:[#allocation2 + $0xb] ss:$16 sm:$0xc]  ;;  %v700_v17 = vor.u32 %v1708_v50, %v698_v0 }
 0x224   :  { %v530_v7 = vld [vmem:[#allocation2] ss:$16 sm:$0xc]  ;;  %v1720_v11 = vld [vmem:[#allocation2 + $0xa] ss:$16 sm:$0xc0]  ;;  %v584_v13 = vor.u32 %v583_v52, %v582_v1  ;;  %v654_v35 = vor.u32 %v653_v63, %v652_v16 }
 0x225   :  { %v532_v8 = vld [vmem:[#allocation2] ss:$16 sm:$0x30]  ;;  %v712_v12 = vld [vmem:[#allocation2 + $0xf] ss:$16 sm:$0xc]  ;;  %v702_v41 = vor.u32 %v701_v4, %v700_v17 }
 0x226   :  { %v534_v14 = vld [vmem:[#allocation2] ss:$16 sm:$0xc0]  ;;  %v703_v18 = vld [vmem:[#allocation2 + $0xe] ss:$16 sm:$0xc0]  ;;  %v586_v30 = vor.u32 %v585_v56, %v584_v13  ;;  %v656_v49 = vor.u32 %v1720_v11, %v654_v35 }
 0x227   :  { %574 = vrot.lane.b32.xlu1 %v572_v58, %s1459_s29  ;;  %623 = vrot.lane.b32.xlu0 %v621_v59, %s1459_s29  ;;  %v529_v15 = vld [vmem:[#allocation2] ss:$16 sm:$0x3]  ;;  %v663_v19 = vld [vmem:[#allocation2 + $0xb] ss:$16 sm:$0x3]  ;;  %v704_v54 = vor.u32 %v703_v18, %v702_v41 }
 0x228   :  { %v531_v21 = vor.u32 %v530_v7, %v529_v15  ;;  %v753_v22 = vld [vmem:[%s1897_s4 + $0xd0] sm:$0xff]  ;;  %v754_v23 = vld [vmem:[%s1897_s4 + $0xd8] sm:$0xff]  ;;  %v1405_v24 = vld [vmem:[#allocation4 + $0x40] sm:$0xff]   ;;  %v665_v42 = vor.u32 %v1716_v5, %v663_v19  ;;  %587 = vst.msk [vmem:[#allocation3 + $0x8] sm:$0xff] %vm512_vm1, %v586_v30 }
 0x229   :  { %v666_v27 = vld [vmem:[#allocation2 + $0xb] ss:$16 sm:$0x30]  ;;  %v711_v28 = vld [vmem:[#allocation2 + $0xf] ss:$16 sm:$0x3]  ;;  %v1326_v20 = vpack.c.bf16 %v754_v23, %v753_v22  ;;  %914 = vmatpush1.bf16.msra.mxu1 %v1405_v24 }
 0x22a   :  { %v714_v29 = vld [vmem:[#allocation2 + $0xf] ss:$16 sm:$0x30]  ;;  %v755_v34 = vld [vmem:[%s1897_s4 + $0xe0] sm:$0xff]  ;;  %v533_v36 = vor.u32 %v532_v8, %v531_v21  ;;  %v757_v48 = vld [vmem:[%s1897_s4 + $0xf0] sm:$0xff]  ;;  %v713_v50 = vor.u32 %v712_v12, %v711_v28  ;;  %915 = vmatprep.subr.bf16.mxu1 %v1457_v31  ;;  %v667_v59 = vor.u32 %v666_v27, %v665_v42 }
 0x22b   :  { %v738_v33 = vld [vmem:[%s1897_s4 + $0x58] sm:$0xff]  ;;  %v756_v38 = vld [vmem:[%s1897_s4 + $0xe8] sm:$0xff]  ;;  %v739_v40 = vld [vmem:[%s1897_s4 + $0x60] sm:$0xff]  ;;  %645 = vrot.lane.b32.xlu1 %v643_v25, %s1458_s2  ;;  %1327 = vmatprep.subr.bf16.mxu0 %v1326_v20  ;;  %v1334_v6 = vpack.c.bf16 %v758_v61, %v757_v48 }
 0x22c   :  { %v1328_v37 = vpack.c.bf16 %v738_v33, %v737_v32  ;;  %693 = vrot.lane.b32.xlu0 %v691_v26, %s1458_s2  ;;  %v668_v43 = vld [vmem:[#allocation2 + $0xb] ss:$16 sm:$0xc0]  ;;  %v716_v44 = vld [vmem:[#allocation2 + $0xf] ss:$16 sm:$0xc0]  ;;  %v1330_v45 = vpack.c.bf16 %v756_v38, %v755_v34  ;;  %v535_v51 = vor.u32 %v534_v14, %v533_v36  ;;  %v715_v60 = vor.u32 %v714_v29, %v713_v50 }
 0x22d   :  { %v740_v46 = vld [vmem:[%s1897_s4 + $0x68] sm:$0xff]  ;;  %v1407_v3 = vld [vmem:[#allocation4 + $0x50] sm:$0xff]   ;;  %v669_v4 = vor.u32 %v668_v43, %v667_v59  ;;  %916 = vmatpush1.bf16.msra.mxu1 %v1406_v39  ;;  %v742_v8 = vld [vmem:[%s1897_s4 + $0x78] sm:$0xff] }
 0x22e   :  { %v628_v47 = vld [vmem:[#allocation2 + $0x8] ss:$16 sm:$0x3]  ;;  %1329 = vmatpush3.bf16.msra.mxu0 %v1328_v37  ;;  %v1332_v55 = vpack.c.bf16 %v740_v46, %v739_v40  ;;  %v676_v58 = vld [vmem:[#allocation2 + $0xc] ss:$16 sm:$0x3]  ;;  %v717_v5 = vor.u32 %v716_v44, %v715_v60  ;;  %917 = vmatprep.subr.bf16.mxu1 %v1457_v31 }
 0x22f   :  { %v629_v52 = vld [vmem:[#allocation2 + $0x8] ss:$16 sm:$0xc]  ;;  %536 = vst.msk [vmem:[#allocation3] sm:$0xff] %vm512_vm1, %v535_v51  ;;  %1331 = vmatprep.subr.bf16.mxu0 %v1330_v45  ;;  %658 = vrot.lane.b32.xlu1 %v656_v49, %s1454_s6  ;;  %v741_v7 = vld [vmem:[%s1897_s4 + $0x70] sm:$0xff]  ;;  %v775_v9 = vld [vmem:[%s1897_s4 + $0x180] sm:$0xff] }
 0x230   :  { %v631_v53 = vld [vmem:[#allocation2 + $0x8] ss:$16 sm:$0x30]  ;;  %v630_v56 = vor.u32 %v629_v52, %v628_v47  ;;  %v677_v62 = vld [vmem:[#allocation2 + $0xc] ss:$16 sm:$0xc]  ;;  %706 = vrot.lane.b32.xlu0 %v704_v54, %s1454_s6  ;;  %v1336_v12 = vpack.c.bf16 %v742_v8, %v741_v7 }
 0x231   :  { %v633_v57 = vld [vmem:[#allocation2 + $0x8] ss:$16 sm:$0xc0]  ;;  %v679_v63 = vld [vmem:[#allocation2 + $0xc] ss:$16 sm:$0x30]  ;;  %v678_v1 = vor.u32 %v677_v62, %v676_v58  ;;  %918 = vmatpush1.bf16.msra.mxu1 %v1407_v3 }
 0x232   :  { %v632_v0 = vor.u32 %v631_v53, %v630_v56  ;;  %v681_v2 = vld [vmem:[#allocation2 + $0xc] ss:$16 sm:$0xc0]  ;;  %1333 = vmatpush3.bf16.msra.mxu0 %v1332_v55  ;;  %v791_v15 = vld [vmem:[%s1894_s1] sm:$0xff]  ;;  %919 = vmatprep.subr.bf16.mxu1 %v1457_v31  ;;  %v777_v30 = vld [vmem:[%s1897_s4 + $0x190] sm:$0xff] }
 0x233   :  { %v680_v11 = vor.u32 %v679_v63, %v678_v1  ;;  %v776_v13 = vld [vmem:[%s1897_s4 + $0x188] sm:$0xff]  ;;  %1335 = vmatprep.subr.bf16.mxu0 %v1334_v6  ;;  %671 = vrot.lane.b32.xlu1 %v669_v4, %s1459_s29  ;;  %v1408_v17 = vld [vmem:[#allocation4 + $0x58] sm:$0xff]   ;;  %v1137_v18 = vcombine.high %v791_v15, %v791_v15  ;;  %v1136_v19 = vcombine.low %v791_v15, %v791_v15  ;;  %v759_v28 = vld [vmem:[%s1897_s4 + $0x100] sm:$0xff] }
 0x234   :  { %v634_v10 = vor.u32 %v633_v57, %v632_v0  ;;  %v1338_v14 = vpack.c.bf16 %v776_v13, %v775_v9  ;;  %719 = vrot.lane.b32.xlu0 %v717_v5, %s1459_s29  ;;  %v760_v29 = vld [vmem:[%s1897_s4 + $0x108] sm:$0xff]  ;;  %v778_v20 = vld [vmem:[%s1897_s4 + $0x198] sm:$0xff]  ;;  %v761_v33 = vld [vmem:[%s1897_s4 + $0x110] sm:$0xff] }
 0x235   :  { %v682_v16 = vor.u32 %v681_v2, %v680_v11  ;;  %1150 = vmatprep.mubr.msk.bf16.mxu1 %vm358_vm0, %v1137_v18  ;;  %920 = vmatpush1.bf16.msra.mxu1 %v1408_v17  ;;  %v1340_v32 = vpack.c.bf16 %v760_v29, %v759_v28  ;;  %v1342_v38 = vpack.c.bf16 %v778_v20, %v777_v30  ;;  %v762_v39 = vld [vmem:[%s1897_s4 + $0x118] sm:$0xff]  ;;  %v779_v40 = vld [vmem:[%s1897_s4 + $0x1a0] sm:$0xff]  ;;  %v780_v41 = vld [vmem:[%s1897_s4 + $0x1a8] sm:$0xff] }
 0x236   :  { %635 = vst.msk [vmem:[#allocation3 + $0x10] sm:$0xff] %vm512_vm1, %v634_v10  ;;  %1337 = vmatpush3.bf16.msra.mxu0 %v1336_v12  ;;  %v1344_v42 = vpack.c.bf16 %v762_v39, %v761_v33  ;;  %v1346_v45 = vpack.c.bf16 %v780_v41, %v779_v40  ;;  %v763_v46 = vld [vmem:[%s1897_s4 + $0x120] sm:$0xff]  ;;  %v764_v47 = vld [vmem:[%s1897_s4 + $0x128] sm:$0xff]  ;;  %v781_v48 = vld [vmem:[%s1897_s4 + $0x1b0] sm:$0xff] }
 0x237   :  { %683 = vst.msk [vmem:[#allocation3 + $0x18] sm:$0xff] %vm512_vm1, %v682_v16  ;;  %1339 = vmatprep.subr.bf16.mxu0 %v1338_v14  ;;  %v782_v49 = vld [vmem:[%s1897_s4 + $0x1b8] sm:$0xff]  ;;  %v1348_v50 = vpack.c.bf16 %v764_v47, %v763_v46  ;;  %v765_v52 = vld [vmem:[%s1897_s4 + $0x130] sm:$0xff]  ;;  %v783_v54 = vld [vmem:[%s1897_s4 + $0x1c0] sm:$0xff] }
 0x238   :  { %930 = vmatmul.mubr.bf16.vlgmr.msra.gmra.mrb[16].mxu1 %v1136_v19  ;;  %v1350_v51 = vpack.c.bf16 %v782_v49, %v781_v48  ;;  %v766_v53 = vld [vmem:[%s1897_s4 + $0x138] sm:$0xff]  ;;  %v784_v55 = vld [vmem:[%s1897_s4 + $0x1c8] sm:$0xff]  ;;  %v767_v59 = vld [vmem:[%s1897_s4 + $0x140] sm:$0xff] }
 0x239   :  { %v1352_v56 = vpack.c.bf16 %v766_v53, %v765_v52  ;;  %v1354_v58 = vpack.c.bf16 %v784_v55, %v783_v54  ;;  %v768_v60 = vld [vmem:[%s1897_s4 + $0x148] sm:$0xff]  ;;  %v785_v62 = vld [vmem:[%s1897_s4 + $0x1d0] sm:$0xff]  ;;  %v786_v63 = vld [vmem:[%s1897_s4 + $0x1d8] sm:$0xff] }
 0x23a   :  { %v1356_v0 = vpack.c.bf16 %v768_v60, %v767_v59  ;;  %v1358_v1 = vpack.c.bf16 %v786_v63, %v785_v62  ;;  %v769_v2 = vld [vmem:[%s1897_s4 + $0x150] sm:$0xff]  ;;  %v770_v61 = vld [vmem:[%s1897_s4 + $0x158] sm:$0xff]  ;;  %v787_v3 = vld [vmem:[%s1897_s4 + $0x1e0] sm:$0xff] }
 0x23b   :  { %v788_v4 = vld [vmem:[%s1897_s4 + $0x1e8] sm:$0xff]  ;;  %v1360_v5 = vpack.c.bf16 %v770_v61, %v769_v2  ;;  %v771_v7 = vld [vmem:[%s1897_s4 + $0x160] sm:$0xff]  ;;  %v789_v9 = vld [vmem:[%s1897_s4 + $0x1f0] sm:$0xff] }
 0x23c   :  { %v1362_v6 = vpack.c.bf16 %v788_v4, %v787_v3  ;;  %v772_v8 = vld [vmem:[%s1897_s4 + $0x168] sm:$0xff]  ;;  %v790_v10 = vld [vmem:[%s1897_s4 + $0x1f8] sm:$0xff]  ;;  %v773_v13 = vld [vmem:[%s1897_s4 + $0x170] sm:$0xff] }
 0x23d   :  { %v1364_v11 = vpack.c.bf16 %v772_v8, %v771_v7  ;;  %v1366_v12 = vpack.c.bf16 %v790_v10, %v789_v9  ;;  %v774_v14 = vld [vmem:[%s1897_s4 + $0x178] sm:$0xff]  ;;  %v1151_v30 = vld [vmem:[%s1900_s7] ss:$0 sm:$0xff] }
 0x23e   :  { %v1368_v15 = vpack.c.bf16 %v774_v14, %v773_v13 }
 0x291   :  { %v611_v21 = vpop.permute.xlu1 %610  ;;  %v598_v22 = vpop.permute.xlu0 %597 }
 0x292   :  { %600 = vst.msk [vmem:[#allocation3 + $0x8] sm:$0xff] %vm549_vm2, %v598_v22 }
 0x293   :  { %613 = vst.msk [vmem:[#allocation3 + $0x8] sm:$0xff] %vm563_vm3, %v611_v21 }
 0x295   :  { %v561_v23 = vpop.permute.xlu1 %560  ;;  %v547_v24 = vpop.permute.xlu0 %546 }
 0x296   :  { %550 = vst.msk [vmem:[#allocation3] sm:$0xff] %vm549_vm2, %v547_v24 }
 0x297   :  { %564 = vst.msk [vmem:[#allocation3] sm:$0xff] %vm563_vm3, %v561_v23 }
 0x299   :  { %v575_v31 = vpop.permute.xlu1 %574  ;;  %v624_v25 = vpop.permute.xlu0 %623 }
 0x29a   :  { %578 = vst.msk [vmem:[#allocation3] sm:$0xff] %vm577_vm4, %v575_v31  ;;  %626 = vst.msk [vmem:[#allocation3 + $0x8] sm:$0xff] %vm577_vm4, %v624_v25  ;;  %v1085_v25 = vlaneseq }
 0x29c   :  { %v1086_v28 = vand.u32 127, %v1085_v25 }
 0x29d   :  { %v646_v26 = vpop.permute.xlu1 %645 }
 0x29e   :  { %v694_v27 = vpop.permute.xlu0 %693  ;;  %648 = vst.msk [vmem:[#allocation3 + $0x10] sm:$0xff] %vm549_vm2, %v646_v26  ;;  %vm1087_vm5 = vcmp.ge.s32.totalorder %v1086_v28, 8  ;;  %vm1098_vm6 = vcmp.lt.s32.totalorder %v1086_v28, 8 }
 0x29f   :  { %696 = vst.msk [vmem:[#allocation3 + $0x18] sm:$0xff] %vm549_vm2, %v694_v27 }
 0x2a1   :  { %v659_v34 = vpop.permute.xlu1 %658  ;;  %v724_v36 = vld [vmem:[#allocation3 + $0x8] sm:$0xff]  ;;  %v723_v37 = vld [vmem:[#allocation3] sm:$0xff] }
 0x2a2   :  { %v707_v35 = vpop.permute.xlu0 %706  ;;  %661 = vst.msk [vmem:[#allocation3 + $0x10] sm:$0xff] %vm563_vm3, %v659_v34  ;;  %1001 = vmatprep.mubr.f32.mxu0 %v724_v36 }
 0x2a3   :  { %709 = vst.msk [vmem:[#allocation3 + $0x18] sm:$0xff] %vm563_vm3, %v707_v35  ;;  %1002 = vmatmul.mubr.f32.vlgmr.msra.gmra.mrb[16].mxu0 %v723_v37 }
 0x2a4   :  { %1341 = vmatpush3.bf16.msra.mxu0 %v1340_v32 }
 0x2a5   :  { %v672_v43 = vpop.permute.xlu1 %671  ;;  %1343 = vmatprep.subr.bf16.mxu0 %v1342_v38 }
 0x2a6   :  { %v720_v44 = vpop.permute.xlu0 %719  ;;  %674 = vst.msk [vmem:[#allocation3 + $0x10] sm:$0xff] %vm577_vm4, %v672_v43 }
 0x2a7   :  { %722 = vst.msk [vmem:[#allocation3 + $0x18] sm:$0xff] %vm577_vm4, %v720_v44 }
 0x2a8   :  { %1345 = vmatpush3.bf16.msra.mxu0 %v1344_v42 }
 0x2a9   :  { %1347 = vmatprep.subr.bf16.mxu0 %v1346_v45 }
 0x2ac   :  { %1349 = vmatpush3.bf16.msra.mxu0 %v1348_v50 }
 0x2ad   :  { %1351 = vmatprep.subr.bf16.mxu0 %v1350_v51  ;;  %v725_v16 = vld [vmem:[#allocation3 + $0x10] sm:$0xff] }
 0x2ae   :  { %v726_v57 = vld [vmem:[#allocation3 + $0x18] sm:$0xff] }
 0x2af   :  { %1071 = vmatprep.mubr.f32.mxu0 %v726_v57 }
 0x2b0   :  { %1353 = vmatpush3.bf16.msra.mxu0 %v1352_v56 }
 0x2b1   :  { %1355 = vmatprep.subr.bf16.mxu0 %v1354_v58 }
 0x2b4   :  { %1357 = vmatpush3.bf16.msra.mxu0 %v1356_v0 }
 0x2b5   :  { %1359 = vmatprep.subr.bf16.mxu0 %v1358_v1 }
 0x2b8   :  { %1361 = vmatpush3.bf16.msra.mxu0 %v1360_v5 }
 0x2b9   :  { %1363 = vmatprep.subr.bf16.mxu0 %v1362_v6 }
 0x2bc   :  { %1365 = vmatpush3.bf16.msra.mxu0 %v1364_v11 }
 0x2bd   :  { %1367 = vmatprep.subr.bf16.mxu0 %v1366_v12 }
 0x2c0   :  { %1369 = vmatpush3.bf16.msra.mxu0 %v1368_v15 }
 0x2c3   :  { %1072 = vmatmul.mubr.f32.vlgmr.msra.gmra.mrb[18].mxu0 %v725_v16 }
 0x30b   :  { %v931_v17 = vpop.f32.mrb[16].mxu1 }
 0x30c   :  { %v933_v18 = vpop.f32.mrb[17].mxu1 }
 0x30d   :  { %v934_v19 = vpop.f32.mrb[18].mxu1 }
 0x30e   :  { %v935_v21 = vpop.f32.mrb[19].mxu1 }
 0x376   :  { %v1212_v22 = vpop.f32.mrb[16].mxu0 }
 0x377   :  { %v1213_v23 = vpop.f32.mrb[17].mxu0 }
 0x378   :  { %v1214_v24 = vadd.f32 %v1213_v23, %v1212_v22 }
 0x37a   :  { %v1004_v31 = vadd.f32 %v1214_v24, %v931_v17 }
 0x396   :  { %v1247_v26 = vpop.f32.mrb[18].mxu0 }
 0x397   :  { %v1248_v27 = vpop.f32.mrb[19].mxu0 }
 0x398   :  { %v1249_v29 = vadd.f32 %v1248_v27, %v1247_v26 }
 0x39a   :  { %v1074_v20 = vadd.f32 %v1249_v29, %v1004_v31 }
 0x39c   :  { %v1084_v32 = vadd.f32 %v1151_v30, %v1074_v20 }
 0x39e   :  { %v1088_v33 = vsel %vm1087_vm5, %v1084_v32, -1e+30 }
 0x39f   :  { %1089 = vmax.xlane.f32.xlu0 %v1088_v33 }
 0x42c   :  { %v1090_v34 = vpop.xlane.xlu0 %1089 }
 0x42d   :  { %v1091_v35 = vsub.f32 %v1088_v33, %v1090_v34 }
 0x42f   :  { %v1092_v36 = vmul.f32 1.442695, %v1091_v35 }
 0x431   :  { %1411 = vpow2.f32 %v1092_v36 }
 0x43b   :  { %v1412_v37 = vpop.eup %1411 }
 0x43c   :  { %1094 = vadd.xlane.f32.xlu1 %v1412_v37 }
 0x4c9   :  { %v1095_v38 = vpop.xlane.xlu1 %1094 }
 0x4ca   :  { %1413 = vrcp.f32 %v1095_v38 }
 0x4d4   :  { %v1414_v39 = vpop.eup %1413 }
 0x4d5   :  { %v1097_v40 = vmul.f32 %v1414_v39, %v1412_v37 }
 0x4d7   :  { %v1099_v41 = vsel %vm1098_vm6, %v1084_v32, %v1097_v40 }
 0x4d8   :  { %1100 = vst [vmem:[%s1901_s8] sm:$0xff] %v1099_v41 }
 0x4d9   :  { %1105 = vsyncpa [#allocation5], 1 }
 0x4da   :  { %1106 = vsyncpa [#allocation6], 1 }

</bundles_post_ra>
